<compile_context>
chip_gen: v7x
topology: tpu7x:2x2x1
jax: 0.10.0
libtpu: 0.0.40
codegen_flags: <defaults>
</compile_context>

<pallas_src>
import functools

import jax
import jax.numpy as jnp
from jax.experimental import pallas as pl
from jax.experimental.pallas import tpu as pltpu


def _dgcn_kernel(inp_ref, st_ref, nxn_ref, wg_ref, lru_ref, lc_ref, sm_ref,
                 bc_ref, out_ref, *, N, Fh, out_lanes):
    f32 = jnp.float32
    dot = functools.partial(jnp.dot, preferred_element_type=f32)

    # ---- grid-invariant parameter views ----
    m1t = nxn_ref[0]          # (A*core_w2[0])^T
    m2t = nxn_ref[1]          # (B*core_w2[1])^T
    addm1 = nxn_ref[2]        # core_bias[0] + (-1e16)*(1-A)
    addm2 = nxn_ref[3]        # core_bias[1] + (-1e16)*(1-B)
    wrT = nxn_ref[4]          # (A*dgc_r_w1)^T
    wuT = nxn_ref[5]          # (A*dgc_u_w1)^T
    wcgT = nxn_ref[6]         # (A*dgc_c_w1)^T

    wg = wg_ref[...]          # (F, 2N+2) = [core_w1[0] | core_w1[1] | convert_w.T]
    lruT = lru_ref[...]       # (dim, 2*Fh) = [lin_r_w.T | lin_u_w.T]
    lcT = lc_ref[...]         # (F, Fh)     = lin_c_w.T
    win0 = sm_ref[0:1, :]     # lin_in_w.T row 0   (1, Fh)
    win1 = sm_ref[1:2, :]     # lin_in_w.T row 1
    b_in = sm_ref[2:3, :]     # lin_in bias
    br_f = sm_ref[3:4, :]     # dgc_r_b @ lin_r_w.T + lin_r_b
    bu_f = sm_ref[4:5, :]
    bc_f = sm_ref[5:6, :]
    b_conv = bc_ref[...]      # (1, 2) convert bias

    inp = inp_ref[...]        # (N, 2)  -- this batch's `input`
    st = st_ref[...]          # (N, Fh) -- this batch's `state`

    # lin_in as a VPU FMA (K=2)
    x = inp[:, 0:1] * win0 + inp[:, 1:2] * win1 + b_in          # (N, Fh)
    gru = jnp.concatenate([x, st], axis=-1)                     # (N, F)

    # one wide K=F projection: [z1 | z2 | demand_pre]
    big = dot(gru, wg)                                          # (N, 2N+2)
    z1 = big[:, 0:N]
    z2 = big[:, N:2 * N]
    demand = jnp.tanh(big[:, 2 * N:2 * N + 2] + b_conv) * 0.5   # (N, 2)

    # masked softmax attention, normalization folded into the contraction
    l1 = dot(m1t, z1) + addm1
    e1 = jnp.exp(l1 - jnp.max(l1, axis=-1, keepdims=True))
    l2 = dot(m2t, z2) + addm2
    e2 = jnp.exp(l2 - jnp.max(l2, axis=-1, keepdims=True))
    n1 = dot(e1, inp)                                           # (N, 2)
    n2 = dot(e2, inp)
    v = n1[:, 0:1] * pl.reciprocal(jnp.sum(e1, axis=-1, keepdims=True), approx=False)
    q = n2[:, 1:2] * pl.reciprocal(jnp.sum(e2, axis=-1, keepdims=True), approx=False)
    p = jnp.concatenate([v, q], axis=-1) + demand               # (N, 2)

    # GRU-style gates: LocalGC + Linear folded; r/u linears fused into one dot
    feat_ru = jnp.concatenate([p, st], axis=-1)                 # (N, dim)
    inner_ru = dot(feat_ru, lruT)                               # (N, 2*Fh)
    r = jax.nn.sigmoid(dot(wrT, inner_ru[:, 0:Fh]) + br_f)
    u = jax.nn.sigmoid(dot(wuT, inner_ru[:, Fh:2 * Fh]) + bu_f)
    s = r * st
    feat_c = jnp.concatenate([x, s], axis=-1)                   # (N, F)
    c = jnp.tanh(dot(wcgT, dot(feat_c, lcT)) + bc_f)
    h = u * st + (1.0 - u) * c

    # single lane-dense full-row store: [p | H | zero pad] -> (N, out_lanes)
    pad = out_lanes - 2 - Fh
    out_ref[...] = jnp.concatenate([p, h, jnp.zeros((N, pad), f32)], axis=-1)


def dgcn_cell(inp, state, params):
    """Pallas wrapper. inp: (B, N, 2), state: (B, N, F//2). Returns (p, H)."""
    Bb, N, _ = inp.shape
    Fh = state.shape[-1]
    F = 2 * Fh
    dim = Fh + 2
    f32 = jnp.float32
    OUT = ((Fh + 2 + 127) // 128) * 128     # lane-dense padded output width

    A = params["A"].astype(f32)
    Badj = params["B"].astype(f32)

    # ---- fold / precompute parameters (static algebra, wrapper side) ----
    nxn = jnp.stack([
        (A * params["core_w2"][0]).T,
        (Badj * params["core_w2"][1]).T,
        params["core_bias"][0] + (-1e16) * (1.0 - A),
        params["core_bias"][1] + (-1e16) * (1.0 - Badj),
        (A * params["dgc_r_w1"]).T,
        (A * params["dgc_u_w1"]).T,
        (A * params["dgc_c_w1"]).T,
    ], axis=0).astype(f32)                                          # (7, N, N)

    wg = jnp.concatenate(
        [params["core_w1"][0], params["core_w1"][1], params["convert_w"].T],
        axis=-1).astype(f32)                                        # (F, 2N+2)

    LrT = params["lin_r_w"].T                                       # (dim, Fh)
    LuT = params["lin_u_w"].T
    LcT = params["lin_c_w"].T                                       # (F, Fh)
    lru = jnp.concatenate([LrT, LuT], axis=-1).astype(f32)          # (dim, 2Fh)
    lc = LcT.astype(f32)

    br_fold = params["dgc_r_b"] @ LrT + params["lin_r_b"]
    bu_fold = params["dgc_u_b"] @ LuT + params["lin_u_b"]
    bc_fold = params["dgc_c_b"] @ LcT + params["lin_c_b"]
    smalls = jnp.concatenate(
        [params["lin_in_w"].T, params["lin_in_b"][None],
         br_fold[None], bu_fold[None], bc_fold[None]], axis=0).astype(f32)  # (6, Fh)
    bconv = params["convert_b"][None].astype(f32)                   # (1, 2)

    inp3 = inp.astype(f32)
    st3 = state.astype(f32)

    kernel = functools.partial(_dgcn_kernel, N=N, Fh=Fh, out_lanes=OUT)

    def invariant_spec(arr):
        nd = arr.ndim

        def imap(b):
            return (0,) * nd

        return pl.BlockSpec(arr.shape, imap)

    # advisory cost estimate for XLA scheduling (e.g. when scanned over time)
    flops = int(Bb * (2 * N * F * (2 * N + 2)        # wide projection
                      + 2 * 2 * N * N * N            # logit graph matmuls
                      + 2 * 2 * N * N * 2            # softmax contractions
                      + 2 * N * dim * 2 * Fh         # fused r/u linear
                      + 2 * 2 * N * N * Fh           # r/u graph matmuls
                      + 2 * N * F * Fh               # c linear
                      + 2 * N * N * Fh))             # c graph matmul
    transcendentals = int(Bb * (2 * N * N + N * (2 + 3 * Fh)))
    bytes_accessed = int(4 * (nxn.size + wg.size + lru.size + lc.size + smalls.size
                              + bconv.size + inp3.size + st3.size + Bb * N * OUT))

    out = pl.pallas_call(
        kernel,
        grid_spec=pltpu.PrefetchScalarGridSpec(
            num_scalar_prefetch=0,
            grid=(Bb,),
            in_specs=[
                pl.BlockSpec((None, N, 2), lambda b: (b, 0, 0)),
                pl.BlockSpec((None, N, Fh), lambda b: (b, 0, 0)),
                invariant_spec(nxn),
                invariant_spec(wg),
                invariant_spec(lru),
                invariant_spec(lc),
                invariant_spec(smalls),
                invariant_spec(bconv),
            ],
            out_specs=pl.BlockSpec((None, N, OUT), lambda b: (b, 0, 0)),
        ),
        out_shape=jax.ShapeDtypeStruct((Bb, N, OUT), f32),
        compiler_params=pltpu.CompilerParams(
            dimension_semantics=("parallel",),
            vmem_limit_bytes=64 * 1024 * 1024,
        ),
        cost_estimate=pl.CostEstimate(flops=flops,
                                      transcendentals=transcendentals,
                                      bytes_accessed=bytes_accessed),
    )(inp3, st3, nxn, wg, lru, lc, smalls, bconv)

    return out[..., :2], out[..., 2:2 + Fh]


def init_params(key, N, F):
    """Deterministic synthetic parameters with the shapes from __init__."""
    Fh = F // 2
    dim = Fh + 2
    f32 = jnp.float32
    keys = jax.random.split(key, 20)

    def xavier(k, shape, fan_in, fan_out):
        std = (2.0 / (fan_in + fan_out)) ** 0.5
        return std * jax.random.normal(k, shape, f32)

    A = jnp.clip((jax.random.uniform(keys[0], (N, N)) < 0.3).astype(f32)
                 + jnp.eye(N, dtype=f32), 0.0, 1.0)
    Badj = jnp.clip((jax.random.uniform(keys[1], (N, N)) < 0.3).astype(f32)
                    + jnp.eye(N, dtype=f32), 0.0, 1.0)

    return dict(
        A=A, B=Badj,
        core_w1=xavier(keys[2], (2, F, N), F, N),
        core_w2=xavier(keys[3], (2, N, N), N, N),
        core_bias=jnp.zeros((2, N, 1), f32),
        convert_w=xavier(keys[4], (2, F), F, 2),
        convert_b=0.1 * jax.random.normal(keys[5], (2,), f32),
        dgc_r_w1=xavier(keys[6], (N, N), N, N),
        dgc_r_b=jnp.zeros((dim,), f32),
        dgc_u_w1=xavier(keys[7], (N, N), N, N),
        dgc_u_b=jnp.zeros((dim,), f32),
        dgc_c_w1=xavier(keys[8], (N, N), N, N),
        dgc_c_b=jnp.zeros((F,), f32),
        lin_r_w=xavier(keys[9], (Fh, dim), dim, Fh),
        lin_r_b=0.1 * jax.random.normal(keys[10], (Fh,), f32),
        lin_u_w=xavier(keys[11], (Fh, dim), dim, Fh),
        lin_u_b=0.1 * jax.random.normal(keys[12], (Fh,), f32),
        lin_c_w=xavier(keys[13], (Fh, F), F, Fh),
        lin_c_b=0.1 * jax.random.normal(keys[14], (Fh,), f32),
        lin_in_w=xavier(keys[15], (Fh, 2), 2, Fh),
        lin_in_b=0.1 * jax.random.normal(keys[16], (Fh,), f32),
    )


def reference(inp, st, P):
    """Pure-JAX mirror of the PyTorch forward, for validation."""
    hp = jax.lax.Precision.HIGHEST
    mm = functools.partial(jnp.matmul, precision=hp)
    A, Badj = P["A"], P["B"]

    x = mm(inp, P["lin_in_w"].T) + P["lin_in_b"]
    gru = jnp.concatenate([x, st], -1)

    demand = jnp.tanh(mm(gru, P["convert_w"].T) + P["convert_b"]) * 0.5
    x1 = mm(jnp.swapaxes(gru, -1, -2), A * P["core_w2"][0])
    mask1 = mm(jnp.swapaxes(x1, -1, -2), P["core_w1"][0]) + P["core_bias"][0]
    mask1 = jax.nn.softmax(mask1 + (-1e16) * (1.0 - A), axis=-1)
    x2 = mm(jnp.swapaxes(gru, -1, -2), Badj * P["core_w2"][1])
    mask2 = mm(jnp.swapaxes(x2, -1, -2), P["core_w1"][1]) + P["core_bias"][1]
    mask2 = jax.nn.softmax(mask2 + (-1e16) * (1.0 - Badj), axis=-1)
    v = mm(mask1, inp[..., :1])
    q = mm(mask2, inp[..., 1:])
    p = jnp.concatenate([v, q], -1) + demand

    feat_ru = jnp.concatenate([p, st], -1)
    r = jnp.swapaxes(mm(jnp.swapaxes(feat_ru, -1, -2), A * P["dgc_r_w1"]), -1, -2) + P["dgc_r_b"]
    r = jax.nn.sigmoid(mm(r, P["lin_r_w"].T) + P["lin_r_b"])
    u = jnp.swapaxes(mm(jnp.swapaxes(feat_ru, -1, -2), A * P["dgc_u_w1"]), -1, -2) + P["dgc_u_b"]
    u = jax.nn.sigmoid(mm(u, P["lin_u_w"].T) + P["lin_u_b"])
    s = r * st
    feat_c = jnp.concatenate([x, s], -1)
    c = jnp.swapaxes(mm(jnp.swapaxes(feat_c, -1, -2), A * P["dgc_c_w1"]), -1, -2) + P["dgc_c_b"]
    c = jnp.tanh(mm(c, P["lin_c_w"].T) + P["lin_c_b"])
    H = u * st + (1.0 - u) * c
    return p, H


if __name__ == "__main__":
    key = jax.random.PRNGKey(0)
    Bb, N, F = 2, 16, 8        # batch, nodes, dim_feature
    Fh = F // 2

    kp, ki, ks = jax.random.split(key, 3)
    params = init_params(kp, N, F)
    inp = jax.random.normal(ki, (Bb, N, 2), jnp.float32)      # `input`
    state = jax.random.normal(ks, (Bb, N, Fh), jnp.float32)   # `state`

    p_out, h_out = dgcn_cell(inp, state, params)
    jax.block_until_ready((p_out, h_out))

    p_ref, h_ref = reference(inp, state, params)
    assert p_out.shape == (Bb, N, 2) and h_out.shape == (Bb, N, Fh)
    assert jnp.allclose(p_out, p_ref, atol=1e-4, rtol=1e-4), "p mismatch"
    assert jnp.allclose(h_out, h_ref, atol=1e-4, rtol=1e-4), "H mismatch"
    print("KERNEL_OK")
</pallas_src>

<mosaic_0001>
module attributes {stable_mosaic.version = 11 : i64} {
  func.func @_dgcn_kernel(%arg0: i32, %arg1: memref<1x16x2xf32, #tpu.memory_space<vmem>>, %arg2: memref<1x16x4xf32, #tpu.memory_space<vmem>>, %arg3: memref<7x16x16xf32, #tpu.memory_space<vmem>>, %arg4: memref<8x34xf32, #tpu.memory_space<vmem>>, %arg5: memref<6x8xf32, #tpu.memory_space<vmem>>, %arg6: memref<8x4xf32, #tpu.memory_space<vmem>>, %arg7: memref<6x4xf32, #tpu.memory_space<vmem>>, %arg8: memref<1x2xf32, #tpu.memory_space<vmem>>, %arg9: memref<1x16x128xf32, #tpu.memory_space<vmem>>) attributes {dimension_semantics = [#tpu.dimension_semantics<parallel>], iteration_bounds = array<i64: 2>, scalar_prefetch = 0 : i64, scratch_operands = 0 : i64, tpu.core_type = #tpu.core_type<tc>, window_params = [{transform_indices = @transform_0, window_bounds = array<i64: 1, 16, 2>}, {transform_indices = @transform_1, window_bounds = array<i64: 1, 16, 4>}, {pipeline_mode = #tpu.pipeline_mode<synchronous>, transform_indices = @transform_2, window_bounds = array<i64: 7, 16, 16>}, {pipeline_mode = #tpu.pipeline_mode<synchronous>, transform_indices = @transform_3, window_bounds = array<i64: 8, 34>}, {pipeline_mode = #tpu.pipeline_mode<synchronous>, transform_indices = @transform_4, window_bounds = array<i64: 6, 8>}, {pipeline_mode = #tpu.pipeline_mode<synchronous>, transform_indices = @transform_5, window_bounds = array<i64: 8, 4>}, {pipeline_mode = #tpu.pipeline_mode<synchronous>, transform_indices = @transform_6, window_bounds = array<i64: 6, 4>}, {pipeline_mode = #tpu.pipeline_mode<synchronous>, transform_indices = @transform_7, window_bounds = array<i64: 1, 2>}, {transform_indices = @transform_8, window_bounds = array<i64: 1, 16, 128>}]} {
    %c0 = arith.constant 0 : index
    %c0_0 = arith.constant 0 : index
    %c0_1 = arith.constant 0 : index
    %0 = vector.load %arg3[%c0, %c0_0, %c0_1] : memref<7x16x16xf32, #tpu.memory_space<vmem>>, vector<1x16x16xf32>
    %1 = vector.shape_cast %0 : vector<1x16x16xf32> to vector<16x16xf32>
    %c1 = arith.constant 1 : index
    %c0_2 = arith.constant 0 : index
    %c0_3 = arith.constant 0 : index
    %2 = vector.load %arg3[%c1, %c0_2, %c0_3] : memref<7x16x16xf32, #tpu.memory_space<vmem>>, vector<1x16x16xf32>
    %3 = vector.shape_cast %2 : vector<1x16x16xf32> to vector<16x16xf32>
    %c2 = arith.constant 2 : index
    %c0_4 = arith.constant 0 : index
    %c0_5 = arith.constant 0 : index
    %4 = vector.load %arg3[%c2, %c0_4, %c0_5] : memref<7x16x16xf32, #tpu.memory_space<vmem>>, vector<1x16x16xf32>
    %5 = vector.shape_cast %4 : vector<1x16x16xf32> to vector<16x16xf32>
    %c3 = arith.constant 3 : index
    %c0_6 = arith.constant 0 : index
    %c0_7 = arith.constant 0 : index
    %6 = vector.load %arg3[%c3, %c0_6, %c0_7] : memref<7x16x16xf32, #tpu.memory_space<vmem>>, vector<1x16x16xf32>
    %7 = vector.shape_cast %6 : vector<1x16x16xf32> to vector<16x16xf32>
    %c4 = arith.constant 4 : index
    %c0_8 = arith.constant 0 : index
    %c0_9 = arith.constant 0 : index
    %8 = vector.load %arg3[%c4, %c0_8, %c0_9] : memref<7x16x16xf32, #tpu.memory_space<vmem>>, vector<1x16x16xf32>
    %9 = vector.shape_cast %8 : vector<1x16x16xf32> to vector<16x16xf32>
    %c5 = arith.constant 5 : index
    %c0_10 = arith.constant 0 : index
    %c0_11 = arith.constant 0 : index
    %10 = vector.load %arg3[%c5, %c0_10, %c0_11] : memref<7x16x16xf32, #tpu.memory_space<vmem>>, vector<1x16x16xf32>
    %11 = vector.shape_cast %10 : vector<1x16x16xf32> to vector<16x16xf32>
    %c6 = arith.constant 6 : index
    %c0_12 = arith.constant 0 : index
    %c0_13 = arith.constant 0 : index
    %12 = vector.load %arg3[%c6, %c0_12, %c0_13] : memref<7x16x16xf32, #tpu.memory_space<vmem>>, vector<1x16x16xf32>
    %13 = vector.shape_cast %12 : vector<1x16x16xf32> to vector<16x16xf32>
    %c0_14 = arith.constant 0 : index
    %c0_15 = arith.constant 0 : index
    %14 = vector.load %arg4[%c0_14, %c0_15] : memref<8x34xf32, #tpu.memory_space<vmem>>, vector<8x34xf32>
    %c0_16 = arith.constant 0 : index
    %c0_17 = arith.constant 0 : index
    %15 = vector.load %arg5[%c0_16, %c0_17] : memref<6x8xf32, #tpu.memory_space<vmem>>, vector<6x8xf32>
    %c0_18 = arith.constant 0 : index
    %c0_19 = arith.constant 0 : index
    %16 = vector.load %arg6[%c0_18, %c0_19] : memref<8x4xf32, #tpu.memory_space<vmem>>, vector<8x4xf32>
    %c0_20 = arith.constant 0 : index
    %c0_21 = arith.constant 0 : index
    %17 = vector.load %arg7[%c0_20, %c0_21] : memref<6x4xf32, #tpu.memory_space<vmem>>, vector<1x4xf32>
    %c1_22 = arith.constant 1 : index
    %c0_23 = arith.constant 0 : index
    %18 = vector.load %arg7[%c1_22, %c0_23] : memref<6x4xf32, #tpu.memory_space<vmem>>, vector<1x4xf32>
    %c2_24 = arith.constant 2 : index
    %c0_25 = arith.constant 0 : index
    %19 = vector.load %arg7[%c2_24, %c0_25] : memref<6x4xf32, #tpu.memory_space<vmem>>, vector<1x4xf32>
    %c3_26 = arith.constant 3 : index
    %c0_27 = arith.constant 0 : index
    %20 = vector.load %arg7[%c3_26, %c0_27] : memref<6x4xf32, #tpu.memory_space<vmem>>, vector<1x4xf32>
    %c4_28 = arith.constant 4 : index
    %c0_29 = arith.constant 0 : index
    %21 = vector.load %arg7[%c4_28, %c0_29] : memref<6x4xf32, #tpu.memory_space<vmem>>, vector<1x4xf32>
    %c5_30 = arith.constant 5 : index
    %c0_31 = arith.constant 0 : index
    %22 = vector.load %arg7[%c5_30, %c0_31] : memref<6x4xf32, #tpu.memory_space<vmem>>, vector<1x4xf32>
    %c0_32 = arith.constant 0 : index
    %c0_33 = arith.constant 0 : index
    %23 = vector.load %arg8[%c0_32, %c0_33] : memref<1x2xf32, #tpu.memory_space<vmem>>, vector<1x2xf32>
    %c0_34 = arith.constant 0 : index
    %c0_35 = arith.constant 0 : index
    %c0_36 = arith.constant 0 : index
    %24 = vector.load %arg1[%c0_34, %c0_35, %c0_36] : memref<1x16x2xf32, #tpu.memory_space<vmem>>, vector<1x16x2xf32>
    %25 = vector.shape_cast %24 : vector<1x16x2xf32> to vector<16x2xf32>
    %c0_37 = arith.constant 0 : index
    %c0_38 = arith.constant 0 : index
    %c0_39 = arith.constant 0 : index
    %26 = vector.load %arg2[%c0_37, %c0_38, %c0_39] : memref<1x16x4xf32, #tpu.memory_space<vmem>>, vector<1x16x4xf32>
    %27 = vector.shape_cast %26 : vector<1x16x4xf32> to vector<16x4xf32>
    %28 = vector.extract_strided_slice %25 {offsets = [0, 0], sizes = [16, 1], strides = [1, 1]} : vector<16x2xf32> to vector<16x1xf32>
    %29 = vector.broadcast %28 : vector<16x1xf32> to vector<16x4xf32>
    %30 = vector.broadcast %17 : vector<1x4xf32> to vector<16x4xf32>
    %31 = arith.mulf %29, %30 : vector<16x4xf32>
    %32 = vector.extract_strided_slice %25 {offsets = [0, 1], sizes = [16, 1], strides = [1, 1]} : vector<16x2xf32> to vector<16x1xf32>
    %33 = vector.broadcast %32 : vector<16x1xf32> to vector<16x4xf32>
    %34 = vector.broadcast %18 : vector<1x4xf32> to vector<16x4xf32>
    %35 = arith.mulf %33, %34 : vector<16x4xf32>
    %36 = arith.addf %31, %35 : vector<16x4xf32>
    %37 = vector.broadcast %19 : vector<1x4xf32> to vector<16x4xf32>
    %38 = arith.addf %36, %37 : vector<16x4xf32>
    %39 = tpu.concatenate %38, %27 in 1 : vector<16x4xf32>, vector<16x4xf32> -> vector<16x8xf32>
    %cst = arith.constant dense<0.000000e+00> : vector<16x34xf32>
    %40 = tpu.matmul %39, %14, %cst {dimension_numbers = #tpu.dot_dimension_numbers<[1], [0], [0], [1], [0, 0, 1, 1], [], []>} : vector<16x8xf32>, vector<8x34xf32>, vector<16x34xf32> -> vector<16x34xf32>
    %41 = vector.extract_strided_slice %40 {offsets = [0, 0], sizes = [16, 16], strides = [1, 1]} : vector<16x34xf32> to vector<16x16xf32>
    %42 = vector.extract_strided_slice %40 {offsets = [0, 16], sizes = [16, 16], strides = [1, 1]} : vector<16x34xf32> to vector<16x16xf32>
    %43 = vector.extract_strided_slice %40 {offsets = [0, 32], sizes = [16, 2], strides = [1, 1]} : vector<16x34xf32> to vector<16x2xf32>
    %44 = vector.broadcast %23 : vector<1x2xf32> to vector<16x2xf32>
    %45 = arith.addf %43, %44 : vector<16x2xf32>
    %46 = math.tanh %45 : vector<16x2xf32>
    %cst_40 = arith.constant 5.000000e-01 : f32
    %47 = vector.broadcast %cst_40 : f32 to vector<16x2xf32>
    %48 = arith.mulf %46, %47 : vector<16x2xf32>
    %cst_41 = arith.constant dense<0.000000e+00> : vector<16x16xf32>
    %49 = tpu.matmul %1, %41, %cst_41 {dimension_numbers = #tpu.dot_dimension_numbers<[1], [0], [0], [1], [0, 0, 1, 1], [], []>} : vector<16x16xf32>, vector<16x16xf32>, vector<16x16xf32> -> vector<16x16xf32>
    %50 = arith.addf %49, %5 : vector<16x16xf32>
    %cst_42 = arith.constant dense<0xFF800000> : vector<16xf32>
    %51 = vector.multi_reduction <maximumf>, %50, %cst_42 [1] : vector<16x16xf32> to vector<16xf32>
    %52 = vector.shape_cast %51 : vector<16xf32> to vector<16x1xf32>
    %53 = vector.broadcast %52 : vector<16x1xf32> to vector<16x16xf32>
    %54 = arith.subf %50, %53 : vector<16x16xf32>
    %55 = math.exp %54 : vector<16x16xf32>
    %cst_43 = arith.constant dense<0.000000e+00> : vector<16x16xf32>
    %56 = tpu.matmul %3, %42, %cst_43 {dimension_numbers = #tpu.dot_dimension_numbers<[1], [0], [0], [1], [0, 0, 1, 1], [], []>} : vector<16x16xf32>, vector<16x16xf32>, vector<16x16xf32> -> vector<16x16xf32>
    %57 = arith.addf %56, %7 : vector<16x16xf32>
    %cst_44 = arith.constant dense<0xFF800000> : vector<16xf32>
    %58 = vector.multi_reduction <maximumf>, %57, %cst_44 [1] : vector<16x16xf32> to vector<16xf32>
    %59 = vector.shape_cast %58 : vector<16xf32> to vector<16x1xf32>
    %60 = vector.broadcast %59 : vector<16x1xf32> to vector<16x16xf32>
    %61 = arith.subf %57, %60 : vector<16x16xf32>
    %62 = math.exp %61 : vector<16x16xf32>
    %cst_45 = arith.constant dense<0.000000e+00> : vector<16x2xf32>
    %63 = tpu.matmul %55, %25, %cst_45 {dimension_numbers = #tpu.dot_dimension_numbers<[1], [0], [0], [1], [0, 0, 1, 1], [], []>} : vector<16x16xf32>, vector<16x2xf32>, vector<16x2xf32> -> vector<16x2xf32>
    %cst_46 = arith.constant dense<0.000000e+00> : vector<16x2xf32>
    %64 = tpu.matmul %62, %25, %cst_46 {dimension_numbers = #tpu.dot_dimension_numbers<[1], [0], [0], [1], [0, 0, 1, 1], [], []>} : vector<16x16xf32>, vector<16x2xf32>, vector<16x2xf32> -> vector<16x2xf32>
    %65 = vector.extract_strided_slice %63 {offsets = [0, 0], sizes = [16, 1], strides = [1, 1]} : vector<16x2xf32> to vector<16x1xf32>
    %cst_47 = arith.constant dense<0.000000e+00> : vector<16xf32>
    %66 = vector.multi_reduction <add>, %55, %cst_47 [1] : vector<16x16xf32> to vector<16xf32>
    %67 = vector.shape_cast %66 : vector<16xf32> to vector<16x1xf32>
    %68 = tpu.reciprocal %67 : vector<16x1xf32> -> vector<16x1xf32>
    %69 = arith.mulf %65, %68 : vector<16x1xf32>
    %70 = vector.extract_strided_slice %64 {offsets = [0, 1], sizes = [16, 1], strides = [1, 1]} : vector<16x2xf32> to vector<16x1xf32>
    %cst_48 = arith.constant dense<0.000000e+00> : vector<16xf32>
    %71 = vector.multi_reduction <add>, %62, %cst_48 [1] : vector<16x16xf32> to vector<16xf32>
    %72 = vector.shape_cast %71 : vector<16xf32> to vector<16x1xf32>
    %73 = tpu.reciprocal %72 : vector<16x1xf32> -> vector<16x1xf32>
    %74 = arith.mulf %70, %73 : vector<16x1xf32>
    %75 = tpu.concatenate %69, %74 in 1 : vector<16x1xf32>, vector<16x1xf32> -> vector<16x2xf32>
    %76 = arith.addf %75, %48 : vector<16x2xf32>
    %77 = tpu.concatenate %76, %27 in 1 : vector<16x2xf32>, vector<16x4xf32> -> vector<16x6xf32>
    %cst_49 = arith.constant dense<0.000000e+00> : vector<16x8xf32>
    %78 = tpu.matmul %77, %15, %cst_49 {dimension_numbers = #tpu.dot_dimension_numbers<[1], [0], [0], [1], [0, 0, 1, 1], [], []>} : vector<16x6xf32>, vector<6x8xf32>, vector<16x8xf32> -> vector<16x8xf32>
    %79 = vector.extract_strided_slice %78 {offsets = [0, 0], sizes = [16, 4], strides = [1, 1]} : vector<16x8xf32> to vector<16x4xf32>
    %cst_50 = arith.constant dense<0.000000e+00> : vector<16x4xf32>
    %80 = tpu.matmul %9, %79, %cst_50 {dimension_numbers = #tpu.dot_dimension_numbers<[1], [0], [0], [1], [0, 0, 1, 1], [], []>} : vector<16x16xf32>, vector<16x4xf32>, vector<16x4xf32> -> vector<16x4xf32>
    %81 = vector.broadcast %20 : vector<1x4xf32> to vector<16x4xf32>
    %82 = arith.addf %80, %81 : vector<16x4xf32>
    %83 = arith.negf %82 : vector<16x4xf32>
    %84 = math.exp %83 : vector<16x4xf32>
    %cst_51 = arith.constant 1.000000e+00 : f32
    %85 = vector.broadcast %cst_51 : f32 to vector<16x4xf32>
    %86 = arith.addf %85, %84 : vector<16x4xf32>
    %87 = arith.divf %85, %86 : vector<16x4xf32>
    %88 = vector.extract_strided_slice %78 {offsets = [0, 4], sizes = [16, 4], strides = [1, 1]} : vector<16x8xf32> to vector<16x4xf32>
    %cst_52 = arith.constant dense<0.000000e+00> : vector<16x4xf32>
    %89 = tpu.matmul %11, %88, %cst_52 {dimension_numbers = #tpu.dot_dimension_numbers<[1], [0], [0], [1], [0, 0, 1, 1], [], []>} : vector<16x16xf32>, vector<16x4xf32>, vector<16x4xf32> -> vector<16x4xf32>
    %90 = vector.broadcast %21 : vector<1x4xf32> to vector<16x4xf32>
    %91 = arith.addf %89, %90 : vector<16x4xf32>
    %92 = arith.negf %91 : vector<16x4xf32>
    %93 = math.exp %92 : vector<16x4xf32>
    %cst_53 = arith.constant 1.000000e+00 : f32
    %94 = vector.broadcast %cst_53 : f32 to vector<16x4xf32>
    %95 = arith.addf %94, %93 : vector<16x4xf32>
    %96 = arith.divf %94, %95 : vector<16x4xf32>
    %97 = arith.mulf %87, %27 : vector<16x4xf32>
    %98 = tpu.concatenate %38, %97 in 1 : vector<16x4xf32>, vector<16x4xf32> -> vector<16x8xf32>
    %cst_54 = arith.constant dense<0.000000e+00> : vector<16x4xf32>
    %99 = tpu.matmul %98, %16, %cst_54 {dimension_numbers = #tpu.dot_dimension_numbers<[1], [0], [0], [1], [0, 0, 1, 1], [], []>} : vector<16x8xf32>, vector<8x4xf32>, vector<16x4xf32> -> vector<16x4xf32>
    %cst_55 = arith.constant dense<0.000000e+00> : vector<16x4xf32>
    %100 = tpu.matmul %13, %99, %cst_55 {dimension_numbers = #tpu.dot_dimension_numbers<[1], [0], [0], [1], [0, 0, 1, 1], [], []>} : vector<16x16xf32>, vector<16x4xf32>, vector<16x4xf32> -> vector<16x4xf32>
    %101 = vector.broadcast %22 : vector<1x4xf32> to vector<16x4xf32>
    %102 = arith.addf %100, %101 : vector<16x4xf32>
    %103 = math.tanh %102 : vector<16x4xf32>
    %104 = arith.mulf %96, %27 : vector<16x4xf32>
    %cst_56 = arith.constant 1.000000e+00 : f32
    %105 = vector.broadcast %cst_56 : f32 to vector<16x4xf32>
    %106 = arith.subf %105, %96 : vector<16x4xf32>
    %107 = arith.mulf %106, %103 : vector<16x4xf32>
    %108 = arith.addf %104, %107 : vector<16x4xf32>
    %cst_57 = arith.constant 0.000000e+00 : f32
    %109 = vector.broadcast %cst_57 : f32 to vector<16x122xf32>
    %110 = tpu.concatenate %76, %108, %109 in 1 : vector<16x2xf32>, vector<16x4xf32>, vector<16x122xf32> -> vector<16x128xf32>
    %c0_58 = arith.constant 0 : index
    %c0_59 = arith.constant 0 : index
    %c0_60 = arith.constant 0 : index
    %111 = vector.load %arg9[%c0_58, %c0_59, %c0_60] : memref<1x16x128xf32, #tpu.memory_space<vmem>>, vector<1x16x128xf32>
    %112 = vector.shape_cast %111 : vector<1x16x128xf32> to vector<16x128xf32>
    %113 = vector.shape_cast %110 : vector<16x128xf32> to vector<1x16x128xf32>
    tpu.vector_store %arg9[%c0_58, %c0_59, %c0_60], %113 {strides = array<i32>} : memref<1x16x128xf32, #tpu.memory_space<vmem>>, vector<1x16x128xf32>,
    return
  }
  func.func @transform_0(%arg0: i32) -> (i32, i32, i32) {
    %c0_i32 = arith.constant 0 : i32
    %c0_i32_0 = arith.constant 0 : i32
    %c0_i32_1 = arith.constant 0 : i32
    return %arg0, %c0_i32, %c0_i32_0 : i32, i32, i32
  }
  func.func @transform_1(%arg0: i32) -> (i32, i32, i32) {
    %c0_i32 = arith.constant 0 : i32
    %c0_i32_0 = arith.constant 0 : i32
    %c0_i32_1 = arith.constant 0 : i32
    return %arg0, %c0_i32, %c0_i32_0 : i32, i32, i32
  }
  func.func @transform_2(%arg0: i32) -> (i32, i32, i32) {
    %c0_i32 = arith.constant 0 : i32
    %c0_i32_0 = arith.constant 0 : i32
    %c0_i32_1 = arith.constant 0 : i32
    %c0_i32_2 = arith.constant 0 : i32
    return %c0_i32, %c0_i32_0, %c0_i32_1 : i32, i32, i32
  }
  func.func @transform_3(%arg0: i32) -> (i32, i32) {
    %c0_i32 = arith.constant 0 : i32
    %c0_i32_0 = arith.constant 0 : i32
    %c0_i32_1 = arith.constant 0 : i32
    return %c0_i32, %c0_i32_0 : i32, i32
  }
  func.func @transform_4(%arg0: i32) -> (i32, i32) {
    %c0_i32 = arith.constant 0 : i32
    %c0_i32_0 = arith.constant 0 : i32
    %c0_i32_1 = arith.constant 0 : i32
    return %c0_i32, %c0_i32_0 : i32, i32
  }
  func.func @transform_5(%arg0: i32) -> (i32, i32) {
    %c0_i32 = arith.constant 0 : i32
    %c0_i32_0 = arith.constant 0 : i32
    %c0_i32_1 = arith.constant 0 : i32
    return %c0_i32, %c0_i32_0 : i32, i32
  }
  func.func @transform_6(%arg0: i32) -> (i32, i32) {
    %c0_i32 = arith.constant 0 : i32
    %c0_i32_0 = arith.constant 0 : i32
    %c0_i32_1 = arith.constant 0 : i32
    return %c0_i32, %c0_i32_0 : i32, i32
  }
  func.func @transform_7(%arg0: i32) -> (i32, i32) {
    %c0_i32 = arith.constant 0 : i32
    %c0_i32_0 = arith.constant 0 : i32
    %c0_i32_1 = arith.constant 0 : i32
    return %c0_i32, %c0_i32_0 : i32, i32
  }
  func.func @transform_8(%arg0: i32) -> (i32, i32, i32) {
    %c0_i32 = arith.constant 0 : i32
    %c0_i32_0 = arith.constant 0 : i32
    %c0_i32_1 = arith.constant 0 : i32
    return %arg0, %c0_i32, %c0_i32_0 : i32, i32, i32
  }
}

</mosaic_0001>

<bundles_post_ra>
// kernel: tpu_custom_call.1
= control target key start
LH: loop header
LB: loop body
LE: loop exit
PB: predicated region body
PF: predicated region fallthrough
CT: control target
= control target key end

     0   :  { %s2905_s0 = inlined_call_operand.hbm [shape: f32[2,16,2], index: 0, kind: input, shape index: {}]   ;;  %s2906_s1 = inlined_call_operand.hbm [shape: f32[2,16,4], index: 1, kind: input, shape index: {}]   ;;  %s2907_s2 = inlined_call_operand.hbm [shape: f32[7,16,16], index: 2, kind: input, shape index: {}]   ;;  %s2908_s3 = inlined_call_operand.hbm [shape: f32[8,34], index: 3, kind: input, shape index: {}]   ;;  %s2909_s4 = inlined_call_operand.hbm [shape: f32[6,8], index: 4, kind: input, shape index: {}]   ;;  %s2910_s5 = inlined_call_operand.hbm [shape: f32[8,4], index: 5, kind: input, shape index: {}]   ;;  %s2911_s6 = inlined_call_operand.hbm [shape: f32[6,4], index: 6, kind: input, shape index: {}]   ;;  %s2912_s7 = inlined_call_operand.hbm [shape: f32[1,2], index: 7, kind: input, shape index: {}]   ;;  %s2913_s8 = inlined_call_operand.hbm [shape: f32[2,16,128], index: 8, kind: output, shape index: {}]  }
   0x1   :  { %2921 = sst [smem:[#allocation24_spill]] %s2905_s0 }
   0x2   :  { %2922 = sst [smem:[#allocation25_spill]] %s2907_s2 }
   0x3   :  { %2923 = sst [smem:[#allocation26_spill]] %s2908_s3 }
   0x4   :  { %2924 = sst [smem:[#allocation27_spill]] %s2909_s4 }
   0x5   :  { %2925 = sst [smem:[#allocation28_spill]] %s2910_s5 }
   0x6   :  { %13 = vsyncpa [#allocation3], 0 }
   0x7   :  { %15 = vsyncpa [#allocation3 + $0x1], 0 }
   0x8   :  { %16 = vsyncpa [#allocation6], 0 }
   0x9   :  { %18 = vsyncpa [#allocation6 + $0x1], 0 }
   0xa   :  { %19 = vsyncpa [#allocation9], 0 }
   0xb   :  { %20 = vsyncpa [#allocation12], 0 }
   0xc   :  { %21 = vsyncpa [#allocation15], 0 }
   0xd   :  { %22 = vsyncpa [#allocation4], 0 }
   0xe   :  { %24 = vsyncpa [#allocation4 + $0x1], 0  ;;  %s2430_s27 = smov 0   ;;  %s2432_s28 = smov 0  }
   0xf   :  { %s2434_s29 = smov 0   ;;  %s2436_s30 = smov 0  }
  0x10 LB: > { %s2364_s9 = smov [#allocation7]   ;;  %s2451_s11 = sadd.s32 4294967295, %s2362_s30   ;;  %s2362_s30 = sphi %s2436_s30, %s2957_s30   ;;  %s2358_s29 = sphi %s2434_s29, %s2956_s29   ;;  %s2354_s28 = sphi %s2432_s28, %s2955_s28   ;;  %s2350_s27 = sphi %s2430_s27, %s2954_s27  }
  0x11   : > { %s251_s10 = sshll.u32 %s2364_s9, 4  ;;  %p1677_p0 = scmp.ge.s32.totalorder %s2362_s30, 1  ;;  %s2456_s10 = int_to_ptr.vmem [resolvable:$true] %s251_s10 }
  0x12   : > { %p2916_p1 = scmp.eq.s32.totalorder %s2451_s11, 0  ;;  %p239_p2 = scmp.lt.s32.totalorder %s2362_s30, 3 }
  0x13   : > { %s2365_s13 = smov [#allocation8]   ;;  %s2366_s16 = smov [#allocation11]  }
  0x14   : > { %p2458_p3 = pnand %p1677_p0, %p239_p2  ;;  %s265_s14 = sshll.u32 %s2365_s13, 4  ;;  %s2471_s14 = int_to_ptr.vmem [resolvable:$true] %s265_s14 }
  0x15   : > { %s287_s17 = sshll.u32 %s2366_s16, 4  ;;  %s2928_s2 = sld [smem:[#allocation25_spill]]  ;;  %s2473_s17 = int_to_ptr.vmem [resolvable:$true] %s287_s17 }
  0x16   : > { %s2926_s12 = scalar_select %p2458_p3, 1, 0 }
  0x17   : > { %p1900_p5 = pneg %p2458_p3 }
  0x19   : > { %p2467_p6 = pnand %p1900_p5, %p2916_p1 }
  0x1b   : > { %s2048_s20 = scalar_lea.hbm %s2928_s2, 1792  ;;  %p2483_p8 = pneg %p2467_p6 }
  0x1c   : > { %p2049_p7 = scmp.ne.s32.totalorder %s2928_s2, %s2048_s20  ;;  %p2055_p11 = scmp.lt.u32.totalorder %s2048_s20, %s2928_s2 }
  0x1e   : > { %p2051_p9 = pnand %p2483_p8, %p2049_p7 }
  0x20   : > { %p2052_p10 = pneg %p2051_p9 }
  0x22   : > { %p2057_p12 = pnand %p2055_p11, %p2052_p10 }
  0x24   : > { %2060 = shalt.err (!%p2057_p12)
}
  0x25   : > { %s2061_s26 = scalar_lea.vmem %s2456_s10, 1792  ;;  %p2069_p5 = scmp.lt.s32.totalorder %s2456_s10, %s2456_s10 }
  0x26   : > { %p2062_p13 = scmp.ne.s32.totalorder %s2456_s10, %s2061_s26  ;;  %p2070_p4 = scmp.lt.s32.totalorder %s2061_s26, %s2061_s26 }
  0x28   : > { %p2064_p0 = pnand %p2062_p13, %p2483_p8  ;;  %p2071_p7 = por %p2070_p4, %p2069_p5 }
  0x2a   : > { %p2065_p2 = pneg %p2064_p0 }
  0x2c   : > { %p2072_p9 = pnand %p2071_p7, %p2065_p2 }
  0x2e   : > { %2075 = shalt.err (!%p2072_p9)
}
  0x2f   : > { %s2914_s9 = smov 128   ;;  %s2918_s13 = smov 8  }
  0x30   : > { %1903 = dma.hbm_to_vmem [thread:$0]  (!%p2467_p6), %s2928_s2, 1792, %s2456_s10, [#allocation6], %s2914_s9, %s2914_s9, %s2918_s13  }
  0x31   : > { %s2930_s3 = sld [smem:[#allocation26_spill]] }
  0x37   : > { %s2076_s21 = scalar_lea.hbm %s2930_s3, 128 }
  0x38   : > { %p2077_p4 = scmp.ne.s32.totalorder %s2930_s3, %s2076_s21  ;;  %p2083_p12 = scmp.lt.u32.totalorder %s2076_s21, %s2930_s3 }
  0x3a   : > { %p2079_p10 = pnand %p2077_p4, %p2483_p8 }
  0x3c   : > { %p2080_p11 = pneg %p2079_p10 }
  0x3e   : > { %p2085_p13 = pnand %p2083_p12, %p2080_p11 }
  0x40   : > { %2088 = shalt.err (!%p2085_p13)
}
  0x41   : > { %s2089_s10 = scalar_lea.vmem %s2471_s14, 128  ;;  %p2097_p7 = scmp.lt.s32.totalorder %s2471_s14, %s2471_s14 }
  0x42   : > { %p2090_p0 = scmp.ne.s32.totalorder %s2471_s14, %s2089_s10  ;;  %p2098_p9 = scmp.lt.s32.totalorder %s2089_s10, %s2089_s10 }
  0x44   : > { %p2092_p2 = pnand %p2090_p0, %p2483_p8  ;;  %p2099_p4 = por %p2098_p9, %p2097_p7 }
  0x46   : > { %p2093_p5 = pneg %p2092_p2 }
  0x48   : > { %p2100_p10 = pnand %p2099_p4, %p2093_p5 }
  0x4a   : > { %2103 = shalt.err (!%p2100_p10)
}
  0x4b   : > { %1906 = dma.hbm_to_vmem [thread:$0]  (!%p2467_p6), %s2930_s3, 128, %s2471_s14, [#allocation9]  }
  0x4c   : > { %s2931_s5 = sld [smem:[#allocation28_spill]] }
  0x52   : > { %s2104_s21 = scalar_lea.hbm %s2931_s5, 128 }
  0x53   : > { %p2105_p11 = scmp.ne.s32.totalorder %s2931_s5, %s2104_s21  ;;  %p2111_p0 = scmp.lt.u32.totalorder %s2104_s21, %s2931_s5 }
  0x55   : > { %p2107_p12 = pnand %p2105_p11, %p2483_p8 }
  0x57   : > { %p2108_p13 = pneg %p2107_p12 }
  0x59   : > { %p2113_p2 = pnand %p2111_p0, %p2108_p13 }
  0x5b   : > { %2116 = shalt.err (!%p2113_p2)
}
  0x5c   : > { %s2117_s14 = scalar_lea.vmem %s2473_s17, 128  ;;  %p2125_p4 = scmp.lt.s32.totalorder %s2473_s17, %s2473_s17 }
  0x5d   : > { %p2118_p5 = scmp.ne.s32.totalorder %s2473_s17, %s2117_s14  ;;  %p2126_p10 = scmp.lt.s32.totalorder %s2117_s14, %s2117_s14 }
  0x5f   : > { %p2120_p7 = pnand %p2118_p5, %p2483_p8  ;;  %p2127_p11 = por %p2126_p10, %p2125_p4 }
  0x61   : > { %p2121_p9 = pneg %p2120_p7 }
  0x63   : > { %p2128_p12 = pnand %p2127_p11, %p2121_p9 }
  0x65   : > { %2131 = shalt.err (!%p2128_p12)
}
  0x66   : > { %1912 = dma.hbm_to_vmem [thread:$0]  (!%p2467_p6), %s2931_s5, 128, %s2473_s17, [#allocation12]  }
  0x67   : > { %s2369_s18 = smov [#allocation10]   ;;  %s2370_s20 = smov [#allocation13]  }
  0x68   : > { %s276_s19 = sshll.u32 %s2369_s18, 4  ;;  %s298_s21 = sshll.u32 %s2370_s20, 4  ;;  %s277_s19 = int_to_ptr.vmem [resolvable:$true] %s276_s19  ;;  %s299_s21 = int_to_ptr.vmem [resolvable:$true] %s298_s21 }
  0x69   : > { %s2932_s4 = sld [smem:[#allocation27_spill]] }
  0x6f   : > { %s2132_s25 = scalar_lea.hbm %s2932_s4, 128 }
  0x70   : > { %p2133_p13 = scmp.ne.s32.totalorder %s2932_s4, %s2132_s25  ;;  %p2139_p5 = scmp.lt.u32.totalorder %s2132_s25, %s2932_s4 }
  0x72   : > { %p2135_p0 = pnand %p2133_p13, %p2483_p8 }
  0x74   : > { %p2136_p2 = pneg %p2135_p0 }
  0x76   : > { %p2141_p7 = pnand %p2139_p5, %p2136_p2 }
  0x78   : > { %2144 = shalt.err (!%p2141_p7)
}
  0x79   : > { %s2145_s17 = scalar_lea.vmem %s277_s19, 128  ;;  %p2153_p11 = scmp.lt.s32.totalorder %s277_s19, %s277_s19 }
  0x7a   : > { %p2146_p9 = scmp.ne.s32.totalorder %s277_s19, %s2145_s17  ;;  %p2154_p12 = scmp.lt.s32.totalorder %s2145_s17, %s2145_s17 }
  0x7c   : > { %p2148_p4 = pnand %p2146_p9, %p2483_p8  ;;  %p2155_p1 = por %p2154_p12, %p2153_p11 }
  0x7e   : > { %p2149_p10 = pneg %p2148_p4 }
  0x80   : > { %p2156_p3 = pnand %p2155_p1, %p2149_p10 }
  0x82   : > { %2159 = shalt.err (!%p2156_p3)
}
  0x83   : > { %1909 = dma.hbm_to_vmem [thread:$0]  (!%p2467_p6), %s2932_s4, 128, %s277_s19, [#allocation9]  }
  0x84   : > { %s2160_s22 = scalar_lea.hbm %s2911_s6, 128 }
  0x85   : > { %p2161_p13 = scmp.ne.s32.totalorder %s2911_s6, %s2160_s22  ;;  %p2167_p3 = scmp.lt.u32.totalorder %s2160_s22, %s2911_s6 }
  0x87   : > { %p2163_p0 = pnand %p2161_p13, %p2483_p8 }
  0x89   : > { %p2164_p1 = pneg %p2163_p0 }
  0x8b   : > { %p2169_p2 = pnand %p2167_p3, %p2164_p1 }
  0x8d   : > { %2172 = shalt.err (!%p2169_p2)
}
  0x8e   : > { %s2173_s10 = scalar_lea.vmem %s299_s21, 128  ;;  %p2181_p4 = scmp.lt.s32.totalorder %s299_s21, %s299_s21 }
  0x8f   : > { %p2174_p5 = scmp.ne.s32.totalorder %s299_s21, %s2173_s10  ;;  %p2182_p10 = scmp.lt.s32.totalorder %s2173_s10, %s2173_s10 }
  0x91   : > { %p2176_p7 = pnand %p2174_p5, %p2483_p8  ;;  %p2183_p11 = por %p2182_p10, %p2181_p4 }
  0x93   : > { %p2177_p9 = pneg %p2176_p7 }
  0x95   : > { %p2184_p12 = pnand %p2183_p11, %p2177_p9 }
  0x97   : > { %2187 = shalt.err (!%p2184_p12)
}
  0x98   : > { %1915 = dma.hbm_to_vmem [thread:$0]  (!%p2467_p6), %s2911_s6, 128, %s299_s21, [#allocation12]  }
  0x99   : > { %s2371_s16 = smov [#allocation14]   ;;  %s2188_s22 = scalar_lea.hbm %s2912_s7, 16 }
  0x9a   : > { %s309_s18 = sshll.u32 %s2371_s16, 4  ;;  %p2189_p13 = scmp.ne.s32.totalorder %s2912_s7, %s2188_s22  ;;  %s310_s18 = int_to_ptr.vmem [resolvable:$true] %s309_s18 }
  0x9b   : > { %p2195_p3 = scmp.lt.u32.totalorder %s2188_s22, %s2912_s7 }
  0x9c   : > { %p2191_p0 = pnand %p2189_p13, %p2483_p8 }
  0x9e   : > { %p2192_p1 = pneg %p2191_p0 }
  0xa0   : > { %p2197_p2 = pnand %p2195_p3, %p2192_p1 }
  0xa2   : > { %2200 = shalt.err (!%p2197_p2)
}
  0xa3   : > { %s2201_s21 = scalar_lea.vmem %s310_s18, 16  ;;  %s2208_s10 = scalar_lea.vmem %s310_s18, 32 }
  0xa4   : > { %p2202_p5 = scmp.ne.s32.totalorder %s310_s18, %s2201_s21  ;;  %p2209_p4 = scmp.lt.s32.totalorder %s310_s18, %s310_s18 }
  0xa5   : > { %p2210_p10 = scmp.lt.s32.totalorder %s2208_s10, %s2201_s21 }
  0xa6   : > { %p2204_p7 = pnand %p2202_p5, %p2483_p8 }
  0xa7   : > { %p2211_p11 = por %p2210_p10, %p2209_p4 }
  0xa8   : > { %p2205_p9 = pneg %p2204_p7 }
  0xaa   : > { %p2212_p12 = pnand %p2211_p11, %p2205_p9 }
  0xac   : > { %2215 = shalt.err (!%p2212_p12)
}
  0xad   : > { %1918 = dma.hbm_to_vmem [thread:$0]  (!%p2467_p6), %s2912_s7, 16, %s310_s18, [#allocation15]  }
  0xae   : > { %s1676_s23 = sadd.s32 4294967294, %s2362_s30   ;;  %s2609_s15 = sadd.s32 1, %s2362_s30  }
  0xaf   : > { %s34_s16 = ssub.s32 %s2362_s30, %s2609_s15  ;;  %s37_s9 = sadd.s32 1, %s2358_s29 }
  0xb0   : > { %p35_p8 = scmp.eq.s32.totalorder %s34_s16, 0  ;;  %p44_p13 = scmp.ne.s32.totalorder %s2358_s29, %s2354_s28 }
  0xb1   : > { %p45_p0 = scmp.eq.s32.totalorder %s2362_s30, 0  ;;  %p50_p1 = scmp.ne.s32.totalorder %s2354_s28, %s2350_s27 }
  0xb2   : > { %s2620_s20 = scalar_select %p35_p8, %s2358_s29, %s37_s9  }
  0xb3   : > { %p2622_p3 = por %p45_p0, %p44_p13  ;;  %p2934_p2 = scmp.eq.s32.totalorder %s2451_s11, 0 }
  0xb4   : > { %p226_p5 = scmp.eq.s32.totalorder %s2451_s11, 1  ;;  %p232_p7 = scmp.eq.s32.totalorder %s1676_s23, 1 }
  0xb5   : > { %p2628_p6 = por %p2934_p2, %p50_p1  ;;  %p1936_p9 = scmp.lt.s32.totalorder %s2362_s30, 2 }
  0xb6   : > { %s320_s24 = sand.u32 1, %s2358_s29   ;;  %p2635_p4 = por %p226_p5, %p44_p13 }
  0xb7   : > { %p2639_p10 = por %p232_p7, %p50_p1  ;;  %s1685_s14 = sshll.u32 %s320_s24, 4 }
  0xb8   : > { %s2936_s25 = scalar_select %p2635_p4, 1, 0 }
  0xb9   : > { %s2937_s26 = scalar_select %p2639_p10, 1, 0 }
  0xba   : > { %s1738_s21 = sshll.u32 %s2362_s30, 8  ;;  %s2938_s0 = sld [smem:[#allocation24_spill]] }
  0xbb   : > { %s324_s23 = scalar_lea.vmem [#allocation2], %s1685_s14  ;;  %p2653_p11 = pnand %p1936_p9, %p2622_p3 }
  0xbc   : > { %s331_s16 = sshll.u32 %s324_s23, 4  ;;  %s2660_s10 = scalar_lea.hbm %s2906_s1, %s1738_s21  ;;  %s2649_s16 = int_to_ptr.vmem [resolvable:$true] %s331_s16 }
  0xbd   : > { %s345_s19 = scalar_lea.vmem [#allocation5], %s1685_s14  ;;  %s2664_s4 = scalar_lea.sflag [#allocation3], %s320_s24 }
  0xbe   : > { %s2662_s3 = sshll.u32 %s345_s19, 4  ;;  %p2218_p8 = pneg %p2653_p11  ;;  %s2696_s3 = int_to_ptr.vmem [resolvable:$true] %s2662_s3 }
  0xc0   : > { %s2647_s17 = scalar_lea.hbm %s2938_s0, %s1738_s21  ;;  %s2221_s2 = scalar_lea.hbm %s2938_s0, 512 }
  0xc1   : > { %s2216_s23 = scalar_lea.hbm %s2647_s17, 256  ;;  %p2222_p1 = scmp.lt.u32.totalorder %s2647_s17, %s2938_s0 }
  0xc2   : > { %p2217_p12 = scmp.ne.s32.totalorder %s2647_s17, %s2216_s23  ;;  %p2223_p3 = scmp.lt.u32.totalorder %s2221_s2, %s2216_s23 }
  0xc3   : > { %p2225_p5 = scmp.lt.u32.totalorder %s2216_s23, %s2647_s17 }
  0xc4   : > { %p2219_p13 = pnand %p2218_p8, %p2217_p12  ;;  %p2224_p2 = por %p2223_p3, %p2222_p1 }
  0xc6   : > { %p2220_p0 = pneg %p2219_p13  ;;  %p2226_p7 = por %p2225_p5, %p2224_p2 }
  0xc8   : > { %p2227_p9 = pnand %p2226_p7, %p2220_p0 }
  0xca   : > { %2230 = shalt.err (!%p2227_p9)
}
  0xcb   : > { %s2231_s24 = scalar_lea.vmem %s2649_s16, 256  ;;  %s2372_s5 = smov [#allocation2]  }
  0xcc   : > { %p2232_p12 = scmp.ne.s32.totalorder %s2649_s16, %s2231_s24  ;;  %s2236_s14 = sshll.u32 %s2372_s5, 4  ;;  %s2237_s14 = int_to_ptr.vmem [resolvable:$false] %s2236_s14 }
  0xcd   : > { %s2238_s19 = scalar_lea.vmem %s2237_s14, 512  ;;  %p2239_p4 = scmp.lt.s32.totalorder %s2649_s16, %s2237_s14 }
  0xce   : > { %p2234_p13 = pnand %p2232_p12, %p2218_p8  ;;  %p2240_p1 = scmp.lt.s32.totalorder %s2238_s19, %s2231_s24 }
  0xd0   : > { %p2235_p10 = pneg %p2234_p13  ;;  %p2241_p3 = por %p2240_p1, %p2239_p4 }
  0xd2   : > { %p2242_p2 = pnand %p2241_p3, %p2235_p10 }
  0xd4   : > { %2245 = shalt.err (!%p2242_p2)
}
  0xd5   : > { %s2940_s23 = smov 8   ;;  %s2941_s22 = smov 128  }
  0xd6   : > { %1922 = dma.hbm_to_vmem [thread:$0]  (!%p2653_p11), %s2647_s17, 256, %s2649_s16, %s2664_s4, %s2941_s22, %s2941_s22, %s2940_s23  }
  0xd7   : > { %s341_s2 = sand.u32 1, %s2362_s30   ;;  %s2246_s21 = scalar_lea.hbm %s2660_s10, 256 }
  0xd8   : > { %s2699_s13 = scalar_lea.sflag [#allocation6], %s341_s2  ;;  %p2247_p4 = scmp.ne.s32.totalorder %s2660_s10, %s2246_s21 }
  0xd9   : > { %s2251_s14 = scalar_lea.hbm %s2906_s1, 512  ;;  %p2252_p5 = scmp.lt.u32.totalorder %s2660_s10, %s2906_s1 }
  0xda   : > { %p2249_p10 = pnand %p2247_p4, %p2218_p8  ;;  %p2253_p7 = scmp.lt.u32.totalorder %s2251_s14, %s2246_s21 }
  0xdb   : > { %p2255_p12 = scmp.lt.u32.totalorder %s2246_s21, %s2660_s10 }
  0xdc   : > { %p2250_p0 = pneg %p2249_p10  ;;  %p2254_p9 = por %p2253_p7, %p2252_p5 }
  0xde   : > { %p2256_p13 = por %p2255_p12, %p2254_p9 }
  0xe0   : > { %p2257_p1 = pnand %p2256_p13, %p2250_p0 }
  0xe2   : > { %2260 = shalt.err (!%p2257_p1)
}
  0xe3   : > { %s2261_s4 = scalar_lea.vmem %s2696_s3, 256  ;;  %s2373_s17 = smov [#allocation5]  }
  0xe4   : > { %p2262_p3 = scmp.ne.s32.totalorder %s2696_s3, %s2261_s4  ;;  %s2266_s16 = sshll.u32 %s2373_s17, 4  ;;  %s2267_s16 = int_to_ptr.vmem [resolvable:$false] %s2266_s16 }
  0xe5   : > { %s2268_s0 = scalar_lea.vmem %s2267_s16, 512  ;;  %p2269_p10 = scmp.lt.s32.totalorder %s2696_s3, %s2267_s16 }
  0xe6   : > { %p2264_p2 = pnand %p2262_p3, %p2218_p8  ;;  %p2270_p5 = scmp.lt.s32.totalorder %s2268_s0, %s2261_s4 }
  0xe8   : > { %p2265_p4 = pneg %p2264_p2  ;;  %p2271_p7 = por %p2270_p5, %p2269_p10 }
  0xea   : > { %p2272_p9 = pnand %p2271_p7, %p2265_p4 }
  0xec   : > { %2275 = shalt.err (!%p2272_p9)
}
  0xed   : > { %1925 = dma.hbm_to_vmem [thread:$0]  (!%p2653_p11), %s2660_s10, 256, %s2696_s3, %s2699_s13, %s2941_s22, %s2941_s22, %s2940_s23  }
  0xee   : > { %p2942_p8 = scmp.ne.s32.totalorder %s2926_s12, 0 }
  0xef   : > { %s2731_s2 = sand.u32 (!%p2942_p8), 1, %s2354_s28  }
  0xf0   : > { %364 = sbr.rel (%p2942_p8) target bundleno = 2502 (0x9c6), region = 52  ;;  %s2734_s21 = sshll.u32 (!%p2942_p8), %s2731_s2, 4 }
  0xf1   : > { %s367_s9 = scalar_lea.sflag (!%p2942_p8), [#allocation3], %s2731_s2  ;;  %s370_s24 = scalar_lea.vmem (!%p2942_p8), [#allocation2], %s2734_s21 }
  0xf7   : > { %2321 = dma.done.wait (%p2628_p6), %s367_s9, 256  }
  0xf8   : > { %2323 = vsyncadd (%p2628_p6), %s367_s9, 4294967040  ;;  %s375_s3 = sand.u32 1, %s2451_s11   ;;  %s379_s10 = scalar_lea.vmem [#allocation5], %s2734_s21 }
  0xf9   : > { %s376_s12 = scalar_lea.sflag [#allocation6], %s375_s3 }
  0xfa   : > { %2325 = dma.done.wait (%p2628_p6), %s376_s12, 256  }
  0xfb   : > { %2327 = vsyncadd (%p2628_p6), %s376_s12, 4294967040  ;;  %p2943_p11 = scmp.eq.s32.totalorder %s2451_s11, 0 }
  0xfd   : > { %2329 = dma.done.wait (%p2943_p11), [#allocation6], 1792   ;;  %p2944_p0 = pmov %p2943_p11 }
  0xff   : > { %2331 = vsyncadd (%p2944_p0), [#allocation6], 4294965504  ;;  %p2945_p12 = pmov %p2944_p0 }
 0x100   : > { %p2946_p13 = pmov %p2944_p0 }
 0x101   : > { %2333 = dma.done.wait (%p2945_p12), [#allocation9], 256  }
 0x102   : > { %2335 = vsyncadd (%p2946_p13), [#allocation9], 4294967040  ;;  %p2947_p1 = pmov %p2944_p0 }
 0x103   : > { %p2948_p3 = pmov %p2944_p0 }
 0x104   : > { %2337 = dma.done.wait (%p2947_p1), [#allocation12], 256  }
 0x105   : > { %2339 = vsyncadd (%p2948_p3), [#allocation12], 4294967040  ;;  %p2949_p6 = pmov %p2944_p0 }
 0x106   : > { %p2950_p2 = pmov %p2944_p0 }
 0x107   : > { %2341 = dma.done.wait (%p2949_p6), [#allocation15], 16  }
 0x108   : > { %2343 = vsyncadd (%p2950_p2), [#allocation15], 4294967280  ;;  %v2374_v0 = vmov 0   ;;  %v472_v1 = vld [vmem:[%s370_s24 + $0x8] sm:$0xff]  ;;  %v471_v2 = vld [vmem:[%s370_s24] sm:$0xff]  ;;  %v2375_v4 = vmov 1  }
 0x109   : > { %1996 = vset.pattern.permute.xlu1 %v2374_v0  ;;  %1994 = vset.pattern.permute.xlu0 %v2374_v0  ;;  %v2764_v3 = vpack.c.bf16 %v472_v1, %v471_v2  ;;  %v2766_v5 = vld [vmem:[%s379_s10] sm:$0xff]  ;;  %v2768_v6 = vld [vmem:[%s379_s10 + $0x8] sm:$0xff]  ;;  %s2376_s18 = smov 4   ;;  %vm521_vm0 = vcmask 31744   ;;  %vm524_vm1 = vcmask 64512   ;;  %vm620_vm2 = vcmask 130048  }
 0x10a   : > { %482 = vperm.xlu1 %1996, %v472_v1   ;;  %477 = vperm.xlu0 %1994, %v471_v2   ;;  %v461_v7 = vld [vmem:[#allocation8] sm:$0xff]  ;;  %v1701_v10 = vld [vmem:[#allocation13] ss:$0 sm:$0xff]  ;;  %v1702_v11 = vld [vmem:[#allocation13 + $0x1] ss:$0 sm:$0xff]  ;;  %s2377_s23 = smov 112  }
 0x10b   : > { %1778 = vmatprep.subr.mxu0 %v461_v7  ;;  %v1703_v18 = vld [vmem:[#allocation13 + $0x2] ss:$0 sm:$0xff]  ;;  %v441_v27 = vld [vmem:[#allocation7] sm:$0xff]  ;;  %v444_v28 = vld [vmem:[#allocation7 + $0x10] sm:$0xff]  ;;  %s2378_s22 = smov 32   ;;  %s2379_s13 = smov 96  }
 0x10c   : > { %1779 = vmatpush3.msra.mxu0 %v461_v7  ;;  %1787 = vmatprep.mubr.msk.f32.mxu1 %vm620_vm2, %v441_v27  ;;  %v442_v33 = vld [vmem:[#allocation7 + $0x8] sm:$0xff]  ;;  %v445_v38 = vld [vmem:[#allocation7 + $0x18] sm:$0xff]  ;;  %v447_v40 = vld [vmem:[#allocation7 + $0x20] sm:$0xff]  ;;  %s2380_s5 = smov 2   ;;  %vm1026_vm3 = vcmask 1045504   ;;  %vm997_vm4 = vcmask 7168  }
 0x10d   : > { %v448_v39 = vld [vmem:[#allocation7 + $0x28] sm:$0xff]  ;;  %v451_v47 = vld [vmem:[#allocation7 + $0x38] sm:$0xff]  ;;  %v450_v48 = vld [vmem:[#allocation7 + $0x30] sm:$0xff]  ;;  %vm1016_vm5 = vcmask 15360   ;;  %vm1019_vm6 = vcmask 48128   ;;  %s2381_s14 = smov 124  }
 0x10e   : > { %1997 = vset.pattern.permute.xlu1 %v2375_v4  ;;  %1995 = vset.pattern.permute.xlu0 %v2375_v4  ;;  %v1706_v55 = vld [vmem:[#allocation14] ss:$0 sm:$0xff]  ;;  %s440_s19 = scalar_lea.vmem [#allocation16], %s2734_s21  ;;  %s1740_s17 = sshll.u32 %s2451_s11, 8 }
 0x10f   : > { %496 = vperm.xlu1 %1997, %v472_v1   ;;  %492 = vperm.xlu0 %1995, %v471_v2   ;;  %s1523_s4 = sshll.u32 %s440_s19, 4  ;;  %s2857_s9 = scalar_lea.hbm %s2913_s8, %s1740_s17  ;;  %s2850_s4 = int_to_ptr.vmem [resolvable:$true] %s1523_s4 }
 0x110   : > { %s1510_s11 = scalar_lea.sflag [#allocation4], %s2731_s2  ;;  %s2276_s21 = scalar_lea.vmem %s2850_s4, 256 }
 0x111   : > { %p2277_p4 = scmp.ne.s32.totalorder %s2850_s4, %s2276_s21  ;;  %p2951_p10 = scmp.ne.s32.totalorder %s2936_s25, 0 }
 0x112   : > { %s2382_s24 = smov [#allocation16]  }
 0x113   : > { %515 = vrot.lane.b32.xlu1 %v2766_v5, %s2376_s18  ;;  %517 = vrot.lane.b32.xlu0 %v2768_v6, %s2376_s18  ;;  %p2278_p5 = pnand %p2277_p4, %p2951_p10  ;;  %s2280_s3 = sshll.u32 %s2382_s24, 4  ;;  %s2281_s3 = int_to_ptr.vmem [resolvable:$false] %s2280_s3 }
 0x114   : > { %s2282_s12 = scalar_lea.vmem %s2281_s3, 512  ;;  %p2283_p9 = scmp.lt.s32.totalorder %s2850_s4, %s2281_s3 }
 0x115   : > { %p2279_p7 = pneg %p2278_p5  ;;  %p2284_p8 = scmp.lt.s32.totalorder %s2282_s12, %s2276_s21 }
 0x117   : > { %p2285_p11 = por %p2284_p8, %p2283_p9 }
 0x119   : > { %p2286_p0 = pnand %p2285_p11, %p2279_p7 }
 0x189   : > { %v478_v8 = vpop.permute.xlu0 %477  ;;  %v483_v9 = vpop.permute.xlu1 %482 }
 0x18a   : > { %v489_v14 = vmul.f32 %v1701_v10, %v478_v8  ;;  %v490_v15 = vmul.f32 %v1701_v10, %v483_v9 }
 0x18e   : > { %v497_v12 = vpop.permute.xlu1 %496  ;;  %v493_v13 = vpop.permute.xlu0 %492 }
 0x18f   : > { %v504_v16 = vmul.f32 %v1702_v11, %v497_v12  ;;  %v503_v17 = vmul.f32 %v1702_v11, %v493_v13 }
 0x191   : > { %v506_v19 = vadd.f32 %v504_v16, %v490_v15  ;;  %v505_v20 = vadd.f32 %v503_v17, %v489_v14 }
 0x192   : > { %v516_v21 = vpop.permute.xlu1 %515  ;;  %v518_v22 = vpop.permute.xlu0 %517 }
 0x193   : > { %v2774_v23 = vadd.f32 %v1703_v18, %v506_v19  ;;  %v2776_v24 = vadd.f32 %v1703_v18, %v505_v20 }
 0x195   : > { %v523_v25 = vsel %vm521_vm0, %v2774_v23, %v518_v22  ;;  %v522_v26 = vsel %vm521_vm0, %v2776_v24, %v516_v21  ;;  %v462_v21 = vld [vmem:[#allocation10] sm:$0x3f] }
 0x196   : > { %1780 = vmatprep.mubr.msk.f32.mxu0 %vm524_vm1, %v522_v26 }
 0x197   : > { %1781 = vmatmul.mubr.msk.f32.vlgmr.msra.gmra.mrb[0].mxu0 %vm524_vm1, %v523_v25 }
 0x198   : > { %1794 = vmatprep.mubr.msk.f32.mxu0 %vm620_vm2, %v444_v28 }
 0x26a   : > { %v2786_v29 = vpop.f32.mrb[0].mxu0 }
 0x26b   : > { %v2788_v30 = vpop.f32.mrb[1].mxu0 }
 0x26c   : > { %v1998_v31 = vpack.i.bf16 %v2786_v29, %v2788_v30  ;;  %v1842_v32 = vpack.c.bf16 %v2786_v29, %v2788_v30 }
 0x26e   : > { %1999 = vrot.lane.b32.xlu1 %v1998_v31, %s2377_s23  ;;  %1843 = vmatprep.subr.bf16.mxu1 %v1842_v32 }
 0x26f   : > { %1845 = vmatpush3.bf16.msra.mxu1 %v1842_v32 }
 0x270   : > { %1851 = vmatprep.subr.bf16.mxu1 %v2764_v3 }
 0x272   : > { %1788 = vmatmul.mubr.msk.f32.vlgmr.msra.gmra.mrb[0].mxu1 %vm620_vm2, %v442_v33 }
 0x273   : > { %1853 = vmatpush3.bf16.msra.mxu1 %v2764_v3 }
 0x274   : > { %1811 = vmatprep.subr.msk.mxu1 %vm1026_vm3, %v462_v21 }
 0x2e0   : > { %v2000_v34 = vpop.permute.xlu1 %1999 }
 0x2e1   : > { %v2002_v35 = vunpack.i.h.bf16 %v2000_v34  ;;  %v2001_v36 = vunpack.i.l.bf16 %v2000_v34 }
 0x2e3   : > { %v1846_v37 = vpack.c.bf16 %v2002_v35, %v2001_v36 }
 0x2e5   : > { %1847 = vmatprep.subr.bf16.mxu0 %v1846_v37 }
 0x2e6   : > { %1849 = vmatpush3.bf16.msra.mxu0 %v1846_v37 }
 0x2e7   : > { %1855 = vmatprep.subr.bf16.mxu0 %v2764_v3 }
 0x2e9   : > { %1795 = vmatmul.mubr.msk.f32.vlgmr.msra.gmra.mrb[2].mxu0 %vm620_vm2, %v445_v38 }
 0x2ea   : > { %1857 = vmatpush3.bf16.msra.mxu0 %v2764_v3 }
 0x345   : > { %v1789_v41 = vpop.f32.mrb[0].mxu1 }
 0x346   : > { %v693_v42 = vpop.f32.mrb[1].mxu1  ;;  %v699_v43 = vadd.f32 %v1789_v41, %v448_v39 }
 0x347   : > { %v694_v44 = vadd.f32 %v693_v42, %v447_v40 }
 0x348   : > { %v705_v46 = vsel %vm620_vm2, %v699_v43, -inf }
 0x349   : > { %v702_v45 = vsel %vm620_vm2, %v694_v44, -inf }
 0x34a   : > { %703 = vmax.xlane.f32.xlu0 %v702_v45 }
 0x34e   : > { %706 = vmax.xlane.f32.xlu0 %v705_v46 }
 0x3bc   : > { %v1796_v49 = vpop.f32.mrb[2].mxu0 }
 0x3bd   : > { %v800_v50 = vadd.f32 %v1796_v49, %v451_v47  ;;  %v794_v51 = vpop.f32.mrb[3].mxu0 }
 0x3be   : > { %v795_v52 = vadd.f32 %v794_v51, %v450_v48 }
 0x3bf   : > { %v806_v53 = vsel %vm620_vm2, %v800_v50, -inf }
 0x3c0   : > { %807 = vmax.xlane.f32.xlu0 %v806_v53  ;;  %v803_v54 = vsel %vm620_vm2, %v795_v52, -inf }
 0x3c1   : > { %804 = vmax.xlane.f32.xlu1 %v803_v54 }
 0x3d2   : > { %611 = vrot.lane.b32.xlu1 %v1706_v55, %s2378_s22  ;;  %v454_v55 = vld [vmem:[#allocation7 + $0x48] sm:$0xff] }
 0x3d7   : > { %v704_v56 = vpop.xlane.xlu0 %703 }
 0x3d8   : > { %v708_v57 = vsub.f32 %v694_v44, %v704_v56  ;;  %v1718_v56 = vld [vmem:[#allocation13 + $0x3] ss:$0 sm:$0xff] }
 0x3da   : > { %v710_v58 = vmul.f32 1.442695, %v708_v57 }
 0x3db   : > { %v707_v59 = vpop.xlane.xlu0 %706 }
 0x3dc   : > { %2008 = vpow2.f32 %v710_v58  ;;  %v709_v60 = vsub.f32 %v699_v43, %v707_v59 }
 0x3de   : > { %v712_v61 = vmul.f32 1.442695, %v709_v60 }
 0x3e0   : > { %2010 = vpow2.f32 %v712_v61 }
 0x3e6   : > { %v2009_v62 = vpop.eup %2008 }
 0x3e7   : > { %1801 = vmatprep.mubr.msk.f32.mxu1 %vm620_vm2, %v2009_v62  ;;  %v977_v1 = vsel %vm620_vm2, %v2009_v62, 0.0 }
 0x3ea   : > { %v2011_v63 = vpop.eup %2010 }
 0x3eb   : > { %1802 = vmatmul.mubr.msk.f32.vlgmr.msra.gmra.mrb[2].mxu1 %vm620_vm2, %v2011_v63  ;;  %v980_v0 = vsel %vm620_vm2, %v2011_v63, 0.0 }
 0x3ec   : > { %981 = vadd.xlane.f32.xlu0 %v980_v0  ;;  %1812 = vmatpush3.msk.msra.mxu1 %vm1026_vm3, %v462_v21 }
 0x3f0   : > { %978 = vadd.xlane.f32.xlu0 %v977_v1 }
 0x44d   : > { %v808_v2 = vpop.xlane.xlu0 %807 }
 0x44e   : > { %v810_v3 = vsub.f32 %v800_v50, %v808_v2  ;;  %v805_v4 = vpop.xlane.xlu1 %804  ;;  %v453_v50 = vld [vmem:[#allocation7 + $0x40] sm:$0xff] }
 0x44f   : > { %v809_v7 = vsub.f32 %v795_v52, %v805_v4 }
 0x450   : > { %v813_v8 = vmul.f32 1.442695, %v810_v3  ;;  %v463_v3 = vld [vmem:[#allocation11] sm:$0xff] }
 0x451   : > { %v811_v9 = vmul.f32 1.442695, %v809_v7 }
 0x452   : > { %2012 = vpow2.f32 %v813_v8  ;;  %v612_v10 = vpop.permute.xlu1 %611 }
 0x453   : > { %2014 = vpow2.f32 %v811_v9  ;;  %v614_v11 = vadd.f32 %v612_v10, %v2788_v30  ;;  %v615_v18 = vadd.f32 %v2786_v29, %v612_v10  ;;  %v456_v9 = vld [vmem:[#allocation7 + $0x50] sm:$0xff] }
 0x455   : > { %2016 = vtanh.f32 %v614_v11 }
 0x456   : > { %2018 = vtanh.f32 %v615_v18 }
 0x45c   : > { %v2013_v12 = vpop.eup %2012 }
 0x45d   : > { %v2015_v13 = vpop.eup %2014  ;;  %v990_v14 = vsel %vm620_vm2, %v2013_v12, 0.0 }
 0x45e   : > { %1808 = vmatprep.mubr.msk.f32.mxu0 %vm620_vm2, %v2015_v13  ;;  %991 = vadd.xlane.f32.xlu0 %v990_v14  ;;  %v987_v17 = vsel %vm620_vm2, %v2015_v13, 0.0 }
 0x45f   : > { %v2017_v15 = vpop.eup %2016  ;;  %1809 = vmatmul.mubr.msk.f32.vlgmr.msra.gmra.mrb[4].mxu0 %vm620_vm2, %v2013_v12 }
 0x460   : > { %v618_v16 = vmul.f32 0.5, %v2017_v15  ;;  %v2019_v19 = vpop.eup %2018  ;;  %1820 = vmatprep.mubr.msk.f32.mxu0 %vm620_vm2, %v453_v50 }
 0x461   : > { %v619_v20 = vmul.f32 0.5, %v2019_v19  ;;  %v457_v19 = vld [vmem:[#allocation7 + $0x58] sm:$0xff] }
 0x462   : > { %1002 = vrot.lane.b32.xlu1 %v618_v16, %s2379_s13  ;;  %988 = vadd.xlane.f32.xlu0 %v987_v17 }
 0x466   : > { %1010 = vrot.lane.b32.xlu1 %v2766_v5, %s2380_s5 }
 0x46a   : > { %1012 = vrot.lane.b32.xlu1 %v2768_v6, %s2380_s5 }
 0x478   : > { %1004 = vrot.lane.b32.xlu0 %v619_v20, %s2379_s13  ;;  %v459_v20 = vld [vmem:[#allocation7 + $0x60] sm:$0xff] }
 0x479   : > { %v982_v26 = vpop.xlane.xlu0 %981 }
 0x47a   : > { %2020 = vrcp.f32 %v982_v26 }
 0x47d   : > { %v979_v27 = vpop.xlane.xlu0 %978 }
 0x47e   : > { %2022 = vrcp.f32 %v979_v27  ;;  %v1723_v27 = vld [vmem:[#allocation13 + $0x4] ss:$0 sm:$0xff] }
 0x484   : > { %v2021_v31 = vpop.eup %2020 }
 0x488   : > { %v2023_v32 = vpop.eup %2022 }
 0x4be   : > { %v1803_v22 = vpop.f32.mrb[2].mxu1 }
 0x4bf   : > { %v887_v25 = vpop.f32.mrb[3].mxu1  ;;  %v986_v37 = vmul.f32 %v2021_v31, %v1803_v22 }
 0x4c0   : > { %v985_v40 = vmul.f32 %v2023_v32, %v887_v25 }
 0x4d4   : > { %v1003_v30 = vpop.permute.xlu1 %1002 }
 0x4d8   : > { %v1011_v33 = vpop.permute.xlu1 %1010 }
 0x4dc   : > { %v1013_v47 = vpop.permute.xlu1 %1012 }
 0x4eb   : > { %v992_v28 = vpop.xlane.xlu0 %991 }
 0x4ec   : > { %2024 = vrcp.f32 %v992_v28 }
 0x4ef   : > { %v989_v29 = vpop.xlane.xlu0 %988 }
 0x4f0   : > { %2026 = vrcp.f32 %v989_v29 }
 0x4f3   : > { %v1005_v42 = vpop.permute.xlu0 %1004 }
 0x4f6   : > { %v2025_v34 = vpop.eup %2024 }
 0x4fa   : > { %v2027_v36 = vpop.eup %2026 }
 0x532   : > { %v1810_v35 = vpop.f32.mrb[4].mxu0 }
 0x533   : > { %v996_v38 = vmul.f32 %v2025_v34, %v1810_v35  ;;  %v968_v39 = vpop.f32.mrb[5].mxu0 }
 0x534   : > { %v995_v41 = vmul.f32 %v2027_v36, %v968_v39  ;;  %v1730_v36 = vld [vmem:[#allocation13 + $0x5] ss:$0 sm:$0xff] }
 0x535   : > { %v999_v43 = vsel %vm997_vm4, %v986_v37, %v996_v38 }
 0x536   : > { %v2818_v44 = vadd.f32 %v1005_v42, %v999_v43  ;;  %v998_v45 = vsel %vm997_vm4, %v985_v40, %v995_v41 }
 0x537   : > { %v2820_v46 = vadd.f32 %v1003_v30, %v998_v45 }
 0x538   : > { %v1018_v49 = vsel %vm1016_vm5, %v2818_v44, %v1013_v47 }
 0x539   : > { %v1017_v48 = vsel %vm1016_vm5, %v2820_v46, %v1011_v33 }
 0x53a   : > { %1813 = vmatprep.mubr.msk.f32.mxu1 %vm1019_vm6, %v1017_v48 }
 0x53b   : > { %1814 = vmatmul.mubr.msk.f32.vlgmr.msra.gmra.mrb[4].mxu1 %vm1019_vm6, %v1018_v49 }
 0x53c   : > { %1827 = vmatprep.mubr.msk.f32.mxu1 %vm620_vm2, %v456_v9 }
 0x60e   : > { %v1815_v51 = vpop.f32.mrb[4].mxu1 }
 0x60f   : > { %v1096_v52 = vpop.f32.mrb[5].mxu1 }
 0x610   : > { %v2003_v53 = vpack.i.bf16 %v1815_v51, %v1096_v52  ;;  %v1858_v54 = vpack.c.bf16 %v1815_v51, %v1096_v52 }
 0x612   : > { %1859 = vmatprep.subr.bf16.mxu0 %v1858_v54 }
 0x613   : > { %1861 = vmatpush3.bf16.msra.mxu0 %v1858_v54 }
 0x614   : > { %1830 = vmatprep.subr.mxu0 %v463_v3 }
 0x616   : > { %1821 = vmatmul.mubr.msk.f32.vlgmr.msra.gmra.mrb[6].mxu0 %vm620_vm2, %v454_v55 }
 0x617   : > { %1831 = vmatpush3.msra.mxu0 %v463_v3 }
 0x6e9   : > { %v1822_v57 = vpop.f32.mrb[6].mxu0 }
 0x6ea   : > { %v1187_v58 = vadd.f32 %v1822_v57, %v1718_v56  ;;  %v1181_v59 = vpop.f32.mrb[7].mxu0 }
 0x6eb   : > { %v1182_v60 = vadd.f32 %v1718_v56, %v1181_v59 }
 0x6ec   : > { %v1722_v61 = vmul.f32 -1.442695, %v1187_v58 }
 0x6ed   : > { %v1721_v62 = vmul.f32 -1.442695, %v1182_v60 }
 0x6ee   : > { %2028 = vpow2.f32 %v1722_v61 }
 0x6ef   : > { %2030 = vpow2.f32 %v1721_v62 }
 0x6f8   : > { %v2029_v63 = vpop.eup %2028 }
 0x6f9   : > { %v2031_v0 = vpop.eup %2030  ;;  %v1197_v1 = vadd.f32 1.0, %v2029_v63 }
 0x6fa   : > { %v1196_v2 = vadd.f32 1.0, %v2031_v0 }
 0x6fc   : > { %2032 = vrcp.f32 %v1196_v2 }
 0x6fd   : > { %2034 = vrcp.f32 %v1197_v1 }
 0x706   : > { %v2033_v4 = vpop.eup %2032 }
 0x707   : > { %v1307_v7 = vmul.f32 %v2033_v4, %v2766_v5  ;;  %v2035_v8 = vpop.eup %2034 }
 0x708   : > { %v1308_v10 = vmul.f32 %v2035_v8, %v2768_v6 }
 0x709   : > { %1311 = vrot.lane.b32.xlu1 %v1307_v7, %s2376_s18 }
 0x70d   : > { %1313 = vrot.lane.b32.xlu1 %v1308_v10, %s2376_s18 }
 0x711   : > { %2004 = vrot.lane.b32.xlu1 %v2003_v53, %s2381_s14 }
 0x77b   : > { %v1312_v11 = vpop.permute.xlu1 %1311 }
 0x77c   : > { %v1317_v12 = vsel %vm521_vm0, %v2776_v24, %v1312_v11 }
 0x77d   : > { %1832 = vmatprep.mubr.msk.f32.mxu0 %vm524_vm1, %v1317_v12 }
 0x77f   : > { %v1314_v13 = vpop.permute.xlu1 %1313 }
 0x780   : > { %v1318_v14 = vsel %vm521_vm0, %v2774_v23, %v1314_v13  ;;  %v460_v23 = vld [vmem:[#allocation7 + $0x68] sm:$0xff] }
 0x781   : > { %1833 = vmatmul.mubr.msk.f32.vlgmr.msra.gmra.mrb[8].mxu0 %vm524_vm1, %v1318_v14 }
 0x783   : > { %v2005_v15 = vpop.permute.xlu1 %2004 }
 0x784   : > { %v2007_v16 = vunpack.i.h.bf16 %v2005_v15  ;;  %v2006_v17 = vunpack.i.l.bf16 %v2005_v15 }
 0x786   : > { %v1862_v18 = vpack.c.bf16 %v2007_v16, %v2006_v17 }
 0x788   : > { %1863 = vmatprep.subr.bf16.mxu1 %v1862_v18 }
 0x789   : > { %1865 = vmatpush3.bf16.msra.mxu1 %v1862_v18 }
 0x78c   : > { %1828 = vmatmul.mubr.msk.f32.vlgmr.msra.gmra.mrb[6].mxu1 %vm620_vm2, %v457_v19 }
 0x78d   : > { %1839 = vmatprep.mubr.msk.f32.mxu1 %vm620_vm2, %v459_v20 }
 0x854   : > { %v1834_v24 = vpop.f32.mrb[8].mxu0 }
 0x855   : > { %v1391_v21 = vpop.f32.mrb[9].mxu0 }
 0x856   : > { %v1866_v22 = vpack.c.bf16 %v1834_v24, %v1391_v21 }
 0x858   : > { %1867 = vmatprep.subr.bf16.mxu1 %v1866_v22 }
 0x859   : > { %1869 = vmatpush3.bf16.msra.mxu1 %v1866_v22 }
 0x85c   : > { %1840 = vmatmul.mubr.msk.f32.vlgmr.msra.gmra.mrb[8].mxu1 %vm620_vm2, %v460_v23 }
 0x85f   : > { %v1829_v25 = vpop.f32.mrb[6].mxu1 }
 0x860   : > { %v1286_v26 = vpop.f32.mrb[7].mxu1  ;;  %v1292_v28 = vadd.f32 %v1829_v25, %v1723_v27 }
 0x861   : > { %v1287_v29 = vadd.f32 %v1723_v27, %v1286_v26 }
 0x862   : > { %v1727_v30 = vmul.f32 -1.442695, %v1292_v28 }
 0x863   : > { %v1726_v31 = vmul.f32 -1.442695, %v1287_v29 }
 0x864   : > { %2036 = vpow2.f32 %v1727_v30 }
 0x865   : > { %2038 = vpow2.f32 %v1726_v31 }
 0x86e   : > { %v2037_v32 = vpop.eup %2036 }
 0x86f   : > { %v2039_v33 = vpop.eup %2038  ;;  %v1302_v34 = vadd.f32 1.0, %v2037_v32 }
 0x870   : > { %v1301_v35 = vadd.f32 1.0, %v2039_v33 }
 0x871   : > { %2040 = vrcp.f32 %v1302_v34 }
 0x872   : > { %2042 = vrcp.f32 %v1301_v35 }
 0x87b   : > { %v2041_v41 = vpop.eup %2040 }
 0x87c   : > { %v2043_v42 = vpop.eup %2042  ;;  %v1490_v43 = vsub.f32 1.0, %v2041_v41  ;;  %v1488_v49 = vmul.f32 %v2041_v41, %v2768_v6 }
 0x87d   : > { %v1489_v45 = vsub.f32 1.0, %v2043_v42  ;;  %v1487_v51 = vmul.f32 %v2043_v42, %v2766_v5 }
 0x92f   : > { %v1841_v37 = vpop.f32.mrb[8].mxu1 }
 0x930   : > { %v1482_v38 = vadd.f32 %v1841_v37, %v1730_v36  ;;  %v1476_v39 = vpop.f32.mrb[9].mxu1 }
 0x931   : > { %v1477_v40 = vadd.f32 %v1730_v36, %v1476_v39 }
 0x932   : > { %2044 = vtanh.f32 %v1482_v38 }
 0x933   : > { %2046 = vtanh.f32 %v1477_v40 }
 0x93c   : > { %v2045_v47 = vpop.eup %2044 }
 0x93d   : > { %v2047_v48 = vpop.eup %2046  ;;  %v1492_v50 = vmul.f32 %v2045_v47, %v1490_v43 }
 0x93e   : > { %v1491_v52 = vmul.f32 %v2047_v48, %v1489_v45 }
 0x93f   : > { %v1494_v53 = vadd.f32 %v1492_v50, %v1488_v49 }
 0x940   : > { %v1493_v54 = vadd.f32 %v1491_v52, %v1487_v51 }
 0x941   : > { %1499 = vrot.lane.b32.xlu1 %v1494_v53, %s2380_s5 }
 0x942   : > { %1497 = vrot.lane.b32.xlu0 %v1493_v54, %s2380_s5 }
 0x9b3   : > { %v1500_v6 = vpop.permute.xlu1 %1499 }
 0x9b4   : > { %v1504_v5 = vsel %vm1016_vm5, %v2818_v44, %v1500_v6  ;;  %v1498_v55 = vpop.permute.xlu0 %1497 }
 0x9b5   : > { %v1506_v56 = vsel %vm1019_vm6, %v1504_v5, 0.0  ;;  %v1503_v57 = vsel %vm1016_vm5, %v2820_v46, %v1498_v55 }
 0x9b6   : > { %1508 = vst [vmem:[%s440_s19 + $0x8] sm:$0xff] %v1506_v56  ;;  %v1505_v58 = vsel %vm1019_vm6, %v1503_v57, 0.0 }
 0x9b7   : > { %1507 = vst [vmem:[%s440_s19] sm:$0xff] %v1505_v58 }
 0x9b8   : > { %2289 = shalt.err (!%p2286_p0)
}
 0x9b9   : > { %s2290_s10 = scalar_lea.hbm %s2857_s9, 256  ;;  %s2294_s22 = scalar_lea.hbm %s2913_s8, 512 }
 0x9ba   : > { %p2291_p12 = scmp.ne.s32.totalorder %s2857_s9, %s2290_s10  ;;  %p2295_p3 = scmp.lt.u32.totalorder %s2857_s9, %s2913_s8 }
 0x9bb   : > { %p2296_p6 = scmp.lt.u32.totalorder %s2294_s22, %s2290_s10  ;;  %p2298_p4 = scmp.lt.u32.totalorder %s2290_s10, %s2857_s9 }
 0x9bc   : > { %p2292_p13 = pnand %p2291_p12, %p2951_p10 }
 0x9bd   : > { %p2297_p2 = por %p2296_p6, %p2295_p3 }
 0x9be   : > { %p2293_p1 = pneg %p2292_p13 }
 0x9bf   : > { %p2299_p5 = por %p2298_p4, %p2297_p2 }
 0x9c1   : > { %p2300_p7 = pnand %p2299_p5, %p2293_p1 }
 0x9c3   : > { %2303 = shalt.err (!%p2300_p7)
}
 0x9c4   : > { %s2383_s14 = smov 128   ;;  %s2384_s19 = smov 8  }
 0x9c5   : > { %1898 = dma.vmem_to_hbm [thread:$0]  (%p2951_p10), %s2850_s4, 256, %s2857_s9, %s1510_s11, %s2383_s14, %s2383_s14, %s2384_s19  }
 0x9c6 PF: > { %s1538_s17 = sand.u32 1, %s2350_s27   ;;  %p2952_p9 = scmp.ne.s32.totalorder %s2937_s26, 0 }
 0x9c7   : > { %p2953_p8 = scmp.ge.s32.totalorder %s2362_s30, 2  ;;  %s1539_s16 = scalar_lea.sflag [#allocation4], %s1538_s17 }
 0x9c9   : > { %p1927_p11 = pnand %p2953_p8, %p2952_p9 }
 0x9cb   : > { %2345 = dma.done.wait (!%p1927_p11), %s1539_s16, 256  }
 0x9cc   : > { %2347 = vsyncadd (!%p1927_p11), %s1539_s16, 4294967040  ;;  %p27_p0 = scmp.ge.s32.totalorder %s2609_s15, 4   ;;  %s2954_s27 = smov %s2354_s28 }
 0x9cd   : > { %s2955_s28 = smov %s2358_s29  ;;  %s2956_s29 = smov %s2620_s20 }
 0x9ce   : > { %s2957_s30 = smov %s2609_s15  ;;  %29 = sbr.rel (!%p27_p0) target bundleno = 16 (0x10), region = 140 }
 0x9d5   :  { %1544 = vsyncpa [#allocation3], 1 }
 0x9d6   :  { %1546 = vsyncpa [#allocation3 + $0x1], 1 }
 0x9d7   :  { %1547 = vsyncpa [#allocation6], 1 }
 0x9d8   :  { %1549 = vsyncpa [#allocation6 + $0x1], 1 }
 0x9d9   :  { %1550 = vsyncpa [#allocation9], 1 }
 0x9da   :  { %1551 = vsyncpa [#allocation12], 1 }
 0x9db   :  { %1552 = vsyncpa [#allocation15], 1 }
 0x9dc   :  { %1553 = vsyncpa [#allocation4], 1 }
 0x9dd   :  { %1555 = vsyncpa [#allocation4 + $0x1], 1 }

</bundles_post_ra>
